<compile_context>
chip_gen: v7x
topology: tpu7x:2x2x1
jax: 0.10.0
libtpu: 0.0.40
codegen_flags: <defaults>
</compile_context>

<pallas_src>
import math
from typing import List

import jax
import jax.numpy as jnp
from jax.experimental import pallas as pl
from jax.experimental.pallas import tpu as pltpu


def _round_up(x: int, m: int) -> int:
    return ((x + m - 1) // m) * m


def _make_fused_kernel(n_layers: int):
    """Kernel over refs = (x, w0, b0, w1, b1, ..., out). Weights pre-transposed to (in, out)."""

    def kernel(*refs):
        x_ref = refs[0]
        o_ref = refs[1 + 2 * n_layers]
        h = x_ref[...]                                    # (tile_m, K0) in the input dtype
        for l in range(n_layers):
            w = refs[1 + 2 * l][...]                      # (K_l, N_l_pad), compute dtype (bf16 default)
            b = refs[2 + 2 * l][...]                      # (1, N_l_pad), f32
            # MXU matmul in the weight's (compute) dtype with f32 accumulation;
            # bias broadcast-add stays in f32 on the VPU (v5e has no bf16 VALU).
            h = jnp.dot(h.astype(w.dtype), w, preferred_element_type=jnp.float32) + b
        o_ref[...] = h.astype(o_ref.dtype)

    return kernel


def projection_head_forward(
    x: jax.Array,
    kernel_params,            # list of (wT (K_l, N_l_pad) compute dtype, bias (1, N_l_pad) f32)
    layer_dims: List[int],
    *,
    max_tile_m: int = 512,    # rows per grid step; re-derived into balanced 8-aligned tiles below
    unpad_output: bool = True,
) -> jax.Array:
    M, K = x.shape
    assert K == layer_dims[0], f"input features {K} != layer_dims[0] {layer_dims[0]}"
    n_layers = len(kernel_params)
    N_out = layer_dims[-1]
    N_out_pad = kernel_params[-1][0].shape[1]

    # Balanced batch tiles: sublane-align M, split into near-equal 8-aligned tiles so the
    # tail tile is never mostly padding (e.g. M=300 -> one 304-row tile, not 512).
    M8 = _round_up(M, 8)
    n_tiles = (M8 + max_tile_m - 1) // max_tile_m
    tile_m = _round_up((M8 + n_tiles - 1) // n_tiles, 8)
    M_pad = n_tiles * tile_m

    # Pad rows only when required; K stays unpadded (the x block spans the full feature dim),
    # avoiding the 4x HBM overread of the x stream and the host-side copy for aligned M.
    x_in = x if M_pad == M else jnp.zeros((M_pad, K), x.dtype).at[:M, :].set(x)

    flat_params = []
    for wt, bp in kernel_params:
        flat_params += [wt, bp]

    def build_call(single_buffer_weights: bool):
        wkw = {"pipeline_mode": pl.Buffered(1)} if single_buffer_weights else {}
        in_specs = [pl.BlockSpec((tile_m, K), lambda i: (i, 0))]
        for wt, bp in kernel_params:
            kd, nd = wt.shape
            # Constant index_map -> fetched once, VMEM-resident across the whole grid.
            # Buffered(1) drops the useless second buffer, halving resident-weight VMEM.
            in_specs.append(pl.BlockSpec((kd, nd), lambda i: (0, 0), **wkw))
            in_specs.append(pl.BlockSpec((1, nd), lambda i: (0, 0), **wkw))

        buf = 1 if single_buffer_weights else 2
        weight_bytes = sum(int(a.size) * a.dtype.itemsize for a in flat_params)
        io_bytes = 2 * tile_m * (K + N_out_pad) * x.dtype.itemsize   # double-buffered x / out tiles
        needed = buf * weight_bytes + io_bytes
        # Explicit VMEM budget with ~25% headroom; clamp into [32 MiB, 48 MiB] so it exceeds the
        # scoped defaults (16/32 MiB) everywhere yet stays safe on v7x's 64 MiB/TC.
        vmem_limit = min(max(int(needed * 1.25), 32 << 20), 48 << 20)

        return pl.pallas_call(
            _make_fused_kernel(n_layers),
            out_shape=jax.ShapeDtypeStruct((M_pad, N_out_pad), x.dtype),
            grid=(M_pad // tile_m,),
            in_specs=in_specs,
            out_specs=pl.BlockSpec((tile_m, N_out_pad), lambda i: (i, 0)),
            compiler_params=pltpu.CompilerParams(
                dimension_semantics=("parallel",),   # shards batch tiles across v7x's 2 TCs
                vmem_limit_bytes=vmem_limit,
            ),
        )

    try:
        out_pad = build_call(single_buffer_weights=True)(x_in, *flat_params)
    except Exception:
        # Fallback if this jax build rejects Buffered(1) single-buffering for inputs.
        out_pad = build_call(single_buffer_weights=False)(x_in, *flat_params)

    if not unpad_output:
        return out_pad                      # padded lane-dense layout, no extra slice copy
    return out_pad[:M, :N_out]


class ProjectionHead:
    """Feed-forward stack of Linear layers (single fused Pallas kernel), mirroring the PyTorch module."""

    def __init__(self, layer_dims: List[int], key: jax.Array,
                 dtype=jnp.float32, compute_dtype=jnp.bfloat16) -> None:
        self.layer_dims = list(layer_dims)
        self.dtype = dtype
        self.compute_dtype = compute_dtype

        # torch.nn.Linear-style master params (out, in), f32, for reference / inspection.
        self.params = []
        for size_in, size_out in zip(layer_dims[:-1], layer_dims[1:]):
            key, wk, bk = jax.random.split(key, 3)
            bound = 1.0 / math.sqrt(size_in)  # torch default: U(-1/sqrt(fan_in), 1/sqrt(fan_in))
            w = jax.random.uniform(wk, (size_out, size_in), dtype=dtype,
                                   minval=-bound, maxval=bound)
            b = jax.random.uniform(bk, (size_out,), dtype=dtype,
                                   minval=-bound, maxval=bound)
            self.params.append((w, b))

        # One-time host prep for the kernel:
        #  * pre-transpose to (in, out) so the kernel does jnp.dot(h, w) with no in-kernel transpose,
        #  * pad only the OUTPUT feature dims to 128 (lane-dense MXU operands & unmasked stores);
        #    the first layer's input dim K stays unpadded so the x stream isn't over-read,
        #  * store weights in compute_dtype (bf16 default -> 2-4x MXU rate, half VMEM/HBM bytes),
        #    biases stay f32 (added after the f32-accumulated dot).
        in_dims = [layer_dims[0]] + [_round_up(d, 128) for d in layer_dims[1:-1]]
        out_dims = [_round_up(d, 128) for d in layer_dims[1:]]
        self.kernel_params = []
        for (w, b), kd, nd in zip(self.params, in_dims, out_dims):
            size_out, size_in = w.shape
            wt = jnp.zeros((kd, nd), compute_dtype).at[:size_in, :size_out].set(
                w.T.astype(compute_dtype))
            bp = jnp.zeros((1, nd), jnp.float32).at[0, :size_out].set(b.astype(jnp.float32))
            self.kernel_params.append((wt, bp))
        # TODO(synk): int8 (v5e/v6e) / fp8 (v7x) weight path with per-column dequant scales.
        # TODO(synk): tile the widest layer over an N grid axis (or emit_pipeline over K) once the
        #             resident weight footprint approaches the v7x VMEM budget; currently the whole
        #             stack must fit in VMEM.

    def __call__(self, x: jax.Array, **kw) -> jax.Array:
        return projection_head_forward(x, self.kernel_params, self.layer_dims, **kw)


if __name__ == "__main__":
    key = jax.random.PRNGKey(0)
    key, xk, pk = jax.random.split(key, 3)

    # Small shapes consistent with the module: a 3-layer projection head.
    layer_dims = [32, 64, 16]
    batch = 8
    x = jax.random.normal(xk, (batch, layer_dims[0]), dtype=jnp.float32)

    # Same key -> identical master params; only the kernel compute dtype differs.
    head_f32 = ProjectionHead(layer_dims, pk, compute_dtype=jnp.float32)
    head_bf16 = ProjectionHead(layer_dims, pk, compute_dtype=jnp.bfloat16)

    # Pure-JAX reference (torch nn.Linear semantics: y = x @ W.T + b per layer).
    ref = x
    for w, b in head_f32.params:
        ref = ref @ w.T + b

    out_f32 = jax.block_until_ready(head_f32(x))
    assert out_f32.shape == (batch, layer_dims[-1])
    assert jnp.allclose(out_f32, ref, atol=1e-4, rtol=1e-4), "f32 path mismatch vs reference"

    out_bf16 = jax.block_until_ready(head_bf16(x))
    assert out_bf16.shape == (batch, layer_dims[-1])
    assert jnp.allclose(out_bf16, ref, atol=5e-2, rtol=5e-2), "bf16 path mismatch vs reference"

    print("KERNEL_OK")
</pallas_src>

<mosaic_0001>
module attributes {stable_mosaic.version = 11 : i64} {
  func.func @kernel(%arg0: i32, %arg1: memref<8x32xf32, #tpu.memory_space<vmem>>, %arg2: memref<32x128xf32, #tpu.memory_space<vmem>>, %arg3: memref<1x128xf32, #tpu.memory_space<vmem>>, %arg4: memref<128x128xf32, #tpu.memory_space<vmem>>, %arg5: memref<1x128xf32, #tpu.memory_space<vmem>>, %arg6: memref<8x128xf32, #tpu.memory_space<vmem>>) attributes {dimension_semantics = [#tpu.dimension_semantics<parallel>], iteration_bounds = array<i64: 1>, scalar_prefetch = 0 : i64, scratch_operands = 0 : i64, tpu.core_type = #tpu.core_type<tc>, window_params = [{transform_indices = @transform_0, window_bounds = array<i64: 8, 32>}, {pipeline_mode = #tpu.pipeline_mode<synchronous>, transform_indices = @transform_1, window_bounds = array<i64: 32, 128>}, {pipeline_mode = #tpu.pipeline_mode<synchronous>, transform_indices = @transform_2, window_bounds = array<i64: 1, 128>}, {pipeline_mode = #tpu.pipeline_mode<synchronous>, transform_indices = @transform_3, window_bounds = array<i64: 128, 128>}, {pipeline_mode = #tpu.pipeline_mode<synchronous>, transform_indices = @transform_4, window_bounds = array<i64: 1, 128>}, {transform_indices = @transform_5, window_bounds = array<i64: 8, 128>}]} {
    %c0 = arith.constant 0 : index
    %c0_0 = arith.constant 0 : index
    %0 = vector.load %arg1[%c0, %c0_0] : memref<8x32xf32, #tpu.memory_space<vmem>>, vector<8x32xf32>
    %c0_1 = arith.constant 0 : index
    %c0_2 = arith.constant 0 : index
    %1 = vector.load %arg2[%c0_1, %c0_2] : memref<32x128xf32, #tpu.memory_space<vmem>>, vector<32x128xf32>
    %c0_3 = arith.constant 0 : index
    %c0_4 = arith.constant 0 : index
    %2 = vector.load %arg3[%c0_3, %c0_4] : memref<1x128xf32, #tpu.memory_space<vmem>>, vector<1x128xf32>
    %cst = arith.constant dense<0.000000e+00> : vector<8x128xf32>
    %3 = tpu.matmul %0, %1, %cst {dimension_numbers = #tpu.dot_dimension_numbers<[1], [0], [0], [1], [0, 0, 1, 1], [], []>} : vector<8x32xf32>, vector<32x128xf32>, vector<8x128xf32> -> vector<8x128xf32>
    %4 = vector.broadcast %2 : vector<1x128xf32> to vector<8x128xf32>
    %5 = arith.addf %3, %4 : vector<8x128xf32>
    %c0_5 = arith.constant 0 : index
    %c0_6 = arith.constant 0 : index
    %6 = vector.load %arg4[%c0_5, %c0_6] : memref<128x128xf32, #tpu.memory_space<vmem>>, vector<128x128xf32>
    %c0_7 = arith.constant 0 : index
    %c0_8 = arith.constant 0 : index
    %7 = vector.load %arg5[%c0_7, %c0_8] : memref<1x128xf32, #tpu.memory_space<vmem>>, vector<1x128xf32>
    %cst_9 = arith.constant dense<0.000000e+00> : vector<8x128xf32>
    %8 = tpu.matmul %5, %6, %cst_9 {dimension_numbers = #tpu.dot_dimension_numbers<[1], [0], [0], [1], [0, 0, 1, 1], [], []>} : vector<8x128xf32>, vector<128x128xf32>, vector<8x128xf32> -> vector<8x128xf32>
    %9 = vector.broadcast %7 : vector<1x128xf32> to vector<8x128xf32>
    %10 = arith.addf %8, %9 : vector<8x128xf32>
    %c0_10 = arith.constant 0 : index
    %c0_11 = arith.constant 0 : index
    %11 = vector.load %arg6[%c0_10, %c0_11] : memref<8x128xf32, #tpu.memory_space<vmem>>, vector<8x128xf32>
    tpu.vector_store %arg6[%c0_10, %c0_11], %10 {strides = array<i32>} : memref<8x128xf32, #tpu.memory_space<vmem>>, vector<8x128xf32>,
    return
  }
  func.func @transform_0(%arg0: i32) -> (i32, i32) {
    %c0_i32 = arith.constant 0 : i32
    %c0_i32_0 = arith.constant 0 : i32
    return %arg0, %c0_i32 : i32, i32
  }
  func.func @transform_1(%arg0: i32) -> (i32, i32) {
    %c0_i32 = arith.constant 0 : i32
    %c0_i32_0 = arith.constant 0 : i32
    %c0_i32_1 = arith.constant 0 : i32
    return %c0_i32, %c0_i32_0 : i32, i32
  }
  func.func @transform_2(%arg0: i32) -> (i32, i32) {
    %c0_i32 = arith.constant 0 : i32
    %c0_i32_0 = arith.constant 0 : i32
    %c0_i32_1 = arith.constant 0 : i32
    return %c0_i32, %c0_i32_0 : i32, i32
  }
  func.func @transform_3(%arg0: i32) -> (i32, i32) {
    %c0_i32 = arith.constant 0 : i32
    %c0_i32_0 = arith.constant 0 : i32
    %c0_i32_1 = arith.constant 0 : i32
    return %c0_i32, %c0_i32_0 : i32, i32
  }
  func.func @transform_4(%arg0: i32) -> (i32, i32) {
    %c0_i32 = arith.constant 0 : i32
    %c0_i32_0 = arith.constant 0 : i32
    %c0_i32_1 = arith.constant 0 : i32
    return %c0_i32, %c0_i32_0 : i32, i32
  }
  func.func @transform_5(%arg0: i32) -> (i32, i32) {
    %c0_i32 = arith.constant 0 : i32
    %c0_i32_0 = arith.constant 0 : i32
    return %arg0, %c0_i32 : i32, i32
  }
}

module attributes {stable_mosaic.version = 11 : i64} {
  func.func @kernel(%arg0: i32, %arg1: memref<8x32xf32, #tpu.memory_space<vmem>>, %arg2: memref<32x128xf32, #tpu.memory_space<vmem>>, %arg3: memref<1x128xf32, #tpu.memory_space<vmem>>, %arg4: memref<128x128xf32, #tpu.memory_space<vmem>>, %arg5: memref<1x128xf32, #tpu.memory_space<vmem>>, %arg6: memref<8x128xf32, #tpu.memory_space<vmem>>) attributes {dimension_semantics = [#tpu.dimension_semantics<parallel>], iteration_bounds = array<i64: 1>, scalar_prefetch = 0 : i64, scratch_operands = 0 : i64, tpu.core_type = #tpu.core_type<tc>, window_params = [{transform_indices = @transform_0, window_bounds = array<i64: 8, 32>}, {pipeline_mode = #tpu.pipeline_mode<synchronous>, transform_indices = @transform_1, window_bounds = array<i64: 32, 128>}, {pipeline_mode = #tpu.pipeline_mode<synchronous>, transform_indices = @transform_2, window_bounds = array<i64: 1, 128>}, {pipeline_mode = #tpu.pipeline_mode<synchronous>, transform_indices = @transform_3, window_bounds = array<i64: 128, 128>}, {pipeline_mode = #tpu.pipeline_mode<synchronous>, transform_indices = @transform_4, window_bounds = array<i64: 1, 128>}, {transform_indices = @transform_5, window_bounds = array<i64: 8, 128>}]} {
    %c0 = arith.constant 0 : index
    %c0_0 = arith.constant 0 : index
    %0 = vector.load %arg1[%c0, %c0_0] : memref<8x32xf32, #tpu.memory_space<vmem>>, vector<8x32xf32>
    %c0_1 = arith.constant 0 : index
    %c0_2 = arith.constant 0 : index
    %1 = vector.load %arg2[%c0_1, %c0_2] : memref<32x128xf32, #tpu.memory_space<vmem>>, vector<32x128xf32>
    %c0_3 = arith.constant 0 : index
    %c0_4 = arith.constant 0 : index
    %2 = vector.load %arg3[%c0_3, %c0_4] : memref<1x128xf32, #tpu.memory_space<vmem>>, vector<1x128xf32>
    %cst = arith.constant dense<0.000000e+00> : vector<8x128xf32>
    %3 = tpu.matmul %0, %1, %cst {dimension_numbers = #tpu.dot_dimension_numbers<[1], [0], [0], [1], [0, 0, 1, 1], [], []>} : vector<8x32xf32>, vector<32x128xf32>, vector<8x128xf32> -> vector<8x128xf32>
    %4 = vector.broadcast %2 : vector<1x128xf32> to vector<8x128xf32>
    %5 = arith.addf %3, %4 : vector<8x128xf32>
    %c0_5 = arith.constant 0 : index
    %c0_6 = arith.constant 0 : index
    %6 = vector.load %arg4[%c0_5, %c0_6] : memref<128x128xf32, #tpu.memory_space<vmem>>, vector<128x128xf32>
    %c0_7 = arith.constant 0 : index
    %c0_8 = arith.constant 0 : index
    %7 = vector.load %arg5[%c0_7, %c0_8] : memref<1x128xf32, #tpu.memory_space<vmem>>, vector<1x128xf32>
    %cst_9 = arith.constant dense<0.000000e+00> : vector<8x128xf32>
    %8 = tpu.matmul %5, %6, %cst_9 {dimension_numbers = #tpu.dot_dimension_numbers<[1], [0], [0], [1], [0, 0, 1, 1], [], []>} : vector<8x128xf32>, vector<128x128xf32>, vector<8x128xf32> -> vector<8x128xf32>
    %9 = vector.broadcast %7 : vector<1x128xf32> to vector<8x128xf32>
    %10 = arith.addf %8, %9 : vector<8x128xf32>
    %c0_10 = arith.constant 0 : index
    %c0_11 = arith.constant 0 : index
    %11 = vector.load %arg6[%c0_10, %c0_11] : memref<8x128xf32, #tpu.memory_space<vmem>>, vector<8x128xf32>
    tpu.vector_store %arg6[%c0_10, %c0_11], %10 {strides = array<i32>} : memref<8x128xf32, #tpu.memory_space<vmem>>, vector<8x128xf32>,
    return
  }
  func.func @transform_0(%arg0: i32) -> (i32, i32) {
    %c0_i32 = arith.constant 0 : i32
    %c0_i32_0 = arith.constant 0 : i32
    return %arg0, %c0_i32 : i32, i32
  }
  func.func @transform_1(%arg0: i32) -> (i32, i32) {
    %c0_i32 = arith.constant 0 : i32
    %c0_i32_0 = arith.constant 0 : i32
    %c0_i32_1 = arith.constant 0 : i32
    return %c0_i32, %c0_i32_0 : i32, i32
  }
  func.func @transform_2(%arg0: i32) -> (i32, i32) {
    %c0_i32 = arith.constant 0 : i32
    %c0_i32_0 = arith.constant 0 : i32
    %c0_i32_1 = arith.constant 0 : i32
    return %c0_i32, %c0_i32_0 : i32, i32
  }
  func.func @transform_3(%arg0: i32) -> (i32, i32) {
    %c0_i32 = arith.constant 0 : i32
    %c0_i32_0 = arith.constant 0 : i32
    %c0_i32_1 = arith.constant 0 : i32
    return %c0_i32, %c0_i32_0 : i32, i32
  }
  func.func @transform_4(%arg0: i32) -> (i32, i32) {
    %c0_i32 = arith.constant 0 : i32
    %c0_i32_0 = arith.constant 0 : i32
    %c0_i32_1 = arith.constant 0 : i32
    return %c0_i32, %c0_i32_0 : i32, i32
  }
  func.func @transform_5(%arg0: i32) -> (i32, i32) {
    %c0_i32 = arith.constant 0 : i32
    %c0_i32_0 = arith.constant 0 : i32
    return %arg0, %c0_i32 : i32, i32
  }
}

</mosaic_0001>

<bundles_post_ra>
// kernel: tpu_custom_call.1
= control target key start
LH: loop header
LB: loop body
LE: loop exit
PB: predicated region body
PF: predicated region fallthrough
CT: control target
= control target key end

     0   :  { %10 = vsyncpa [#allocation3], 0  ;;  %s559_s0 = inlined_call_operand.hbm [shape: f32[8,32], index: 0, kind: input, shape index: {}]   ;;  %s560_s1 = inlined_call_operand.hbm [shape: f32[32,128], index: 1, kind: input, shape index: {}]   ;;  %s561_s2 = inlined_call_operand.vmem [shape: f32[1,128], index: 2, kind: input, shape index: {}]   ;;  %s562_s3 = inlined_call_operand.hbm [shape: f32[128,128], index: 3, kind: input, shape index: {}]   ;;  %s563_s4 = inlined_call_operand.vmem [shape: f32[1,128], index: 4, kind: input, shape index: {}]   ;;  %s564_s5 = inlined_call_operand.hbm [shape: f32[8,128], index: 5, kind: output, shape index: {}]  }
   0x1   :  { %11 = vsyncpa [#allocation6], 0 }
   0x2   :  { %12 = vsyncpa [#allocation4], 0  ;;  %s460_s18 = smov [#allocation5]   ;;  %s366_s22 = scalar_lea.hbm %s560_s1, 512 }
   0x3   :  { %s28_s19 = sshll.u32 %s460_s18, 4  ;;  %p367_p0 = scmp.ne.s32.totalorder %s560_s1, %s366_s22  ;;  %s29_s19 = int_to_ptr.vmem [resolvable:$true] %s28_s19 }
   0x4   :  { %p370_p1 = scmp.lt.u32.totalorder %s366_s22, %s560_s1 }
   0x6   :  { %p372_p2 = pnand %p370_p1, %p367_p0 }
   0x8   :  { %375 = shalt.err (!%p372_p2)
}
   0x9   :  { %s376_s27 = scalar_lea.vmem %s29_s19, 512  ;;  %p381_p4 = scmp.lt.s32.totalorder %s29_s19, %s29_s19 }
   0xa   :  { %p377_p3 = scmp.ne.s32.totalorder %s29_s19, %s376_s27  ;;  %p382_p5 = scmp.lt.s32.totalorder %s376_s27, %s376_s27 }
   0xc   :  { %p383_p6 = por %p382_p5, %p381_p4 }
   0xe   :  { %p384_p7 = pnand %p383_p6, %p377_p3 }
  0x10   :  { %387 = shalt.err (!%p384_p7)
}
  0x11   :  { %s461_s28 = smov 128   ;;  %s462_s29 = smov 8  }
  0x12   :  { %34 = dma.hbm_to_vmem [thread:$0]  %s560_s1, 512, %s29_s19, [#allocation6], %s461_s28, %s461_s28, %s462_s29  }
  0x13   :  { %s463_s7 = smov [#allocation2]   ;;  %s464_s9 = smov [#allocation7]  }
  0x14   :  { %s19_s8 = sshll.u32 %s463_s7, 4  ;;  %s42_s10 = sshll.u32 %s464_s9, 4  ;;  %s20_s8 = int_to_ptr.vmem [resolvable:$true] %s19_s8  ;;  %s43_s10 = int_to_ptr.vmem [resolvable:$true] %s42_s10 }
  0x15   :  { %s388_s13 = scalar_lea.hbm %s559_s0, 128 }
  0x16   :  { %p389_p8 = scmp.ne.s32.totalorder %s559_s0, %s388_s13  ;;  %p392_p9 = scmp.lt.u32.totalorder %s388_s13, %s559_s0 }
  0x18   :  { %p394_p10 = pnand %p392_p9, %p389_p8 }
  0x1a   :  { %397 = shalt.err (!%p394_p10)
}
  0x1b   :  { %s398_s1 = scalar_lea.vmem %s20_s8, 128  ;;  %p403_p12 = scmp.lt.s32.totalorder %s20_s8, %s20_s8 }
  0x1c   :  { %p399_p11 = scmp.ne.s32.totalorder %s20_s8, %s398_s1  ;;  %p404_p13 = scmp.lt.s32.totalorder %s398_s1, %s398_s1 }
  0x1e   :  { %p405_p0 = por %p404_p13, %p403_p12 }
  0x20   :  { %p406_p1 = pnand %p405_p0, %p399_p11 }
  0x22   :  { %409 = shalt.err (!%p406_p1)
}
  0x23   :  { %22 = dma.hbm_to_vmem [thread:$0]  %s559_s0, 128, %s20_s8, [#allocation3]  }
  0x24   :  { %s410_s22 = scalar_lea.hbm %s562_s3, 2048 }
  0x25   :  { %p411_p2 = scmp.ne.s32.totalorder %s562_s3, %s410_s22  ;;  %p414_p3 = scmp.lt.u32.totalorder %s410_s22, %s562_s3 }
  0x27   :  { %p416_p4 = pnand %p414_p3, %p411_p2 }
  0x29   :  { %419 = shalt.err (!%p416_p4)
}
  0x2a   :  { %s420_s27 = scalar_lea.vmem %s43_s10, 2048  ;;  %p425_p6 = scmp.lt.s32.totalorder %s43_s10, %s43_s10 }
  0x2b   :  { %p421_p5 = scmp.ne.s32.totalorder %s43_s10, %s420_s27  ;;  %p426_p7 = scmp.lt.s32.totalorder %s420_s27, %s420_s27 }
  0x2d   :  { %p427_p8 = por %p426_p7, %p425_p6 }
  0x2f   :  { %p428_p9 = pnand %p427_p8, %p421_p5 }
  0x31   :  { %431 = shalt.err (!%p428_p9)
}
  0x32   :  { %48 = dma.hbm_to_vmem [thread:$0]  %s562_s3, 2048, %s43_s10, [#allocation6], %s461_s28, %s461_s28, %s462_s29  }
  0x33   :  { %454 = dma.done.wait [#allocation3], 128  }
  0x34   :  { %455 = vsyncadd [#allocation3], 4294967168 }
  0x35   :  { %456 = dma.done.wait [#allocation6], 2560  }
  0x36   :  { %457 = vsyncadd [#allocation6], 4294964736  ;;  %v465_v0 = vmov 0.0|0.0   ;;  %vm466_vm0 = vmmov 0   ;;  %v467_v1 = vmov 0.0   ;;  %v61_v2 = vld [vmem:[#allocation5] sm:$0xff] }
  0x37   :  { %327 = vmatprep.subr.bf16.mxu0 %v465_v0  ;;  %289 = vmatprep.mubr.msk.f32.mxu0 %vm466_vm0, %v467_v1  ;;  %v62_v3 = vld [vmem:[#allocation5 + $0x8] sm:$0xff]  ;;  %v63_v4 = vld [vmem:[#allocation5 + $0x10] sm:$0xff]  ;;  %v64_v6 = vld [vmem:[#allocation5 + $0x18] sm:$0xff]  ;;  %vm72_vm1 = vcmask 261120   ;;  %s468_s7 = smov [#allocation8]  }
  0x38   :  { %333 = vmatprep.subr.bf16.mxu1 %v465_v0  ;;  %324 = vmatprep.mubr.msk.f32.mxu1 %vm466_vm0, %v467_v1  ;;  %v328_v5 = vpack.c.bf16 %v62_v3, %v61_v2  ;;  %v146_v7 = vld [vmem:[#allocation7] sm:$0xff]  ;;  %v147_v8 = vld [vmem:[#allocation7 + $0x8] sm:$0xff]  ;;  %v148_v9 = vld [vmem:[#allocation7 + $0x10] sm:$0xff]  ;;  %v331_v11 = vpack.c.bf16 %v64_v6, %v63_v4  ;;  %s246_s8 = sshll.u32 %s468_s7, 4  ;;  %s247_s8 = int_to_ptr.vmem [resolvable:$true] %s246_s8 }
  0x39   :  { %v149_v10 = vld [vmem:[#allocation7 + $0x18] sm:$0xff]  ;;  %v334_v12 = vpack.c.bf16 %v147_v8, %v146_v7  ;;  %v150_v14 = vld [vmem:[#allocation7 + $0x20] sm:$0xff]  ;;  %v151_v15 = vld [vmem:[#allocation7 + $0x28] sm:$0xff]  ;;  %s432_s9 = scalar_lea.vmem %s247_s8, 128  ;;  %p437_p11 = scmp.lt.s32.totalorder %s247_s8, %s247_s8 }
  0x3a   :  { %329 = vmatpush3.bf16.msra.mxu0 %v328_v5  ;;  %v337_v13 = vpack.c.bf16 %v149_v10, %v148_v9  ;;  %v60_v16 = vld [vmem:[#allocation2] sm:$0xff]  ;;  %v340_v17 = vpack.c.bf16 %v151_v15, %v150_v14  ;;  %v152_v18 = vld [vmem:[#allocation7 + $0x30] sm:$0xff]  ;;  %v154_v21 = vld [vmem:[#allocation7 + $0x40] sm:$0xff]  ;;  %p433_p10 = scmp.ne.s32.totalorder %s247_s8, %s432_s9  ;;  %p438_p12 = scmp.lt.s32.totalorder %s432_s9, %s432_s9 }
  0x3b   :  { %330 = vmatprep.subr.bf16.mxu0 %v465_v0  ;;  %335 = vmatpush3.bf16.msra.mxu1 %v334_v12  ;;  %v153_v19 = vld [vmem:[#allocation7 + $0x38] sm:$0xff]  ;;  %v155_v22 = vld [vmem:[#allocation7 + $0x48] sm:$0xff]  ;;  %v156_v24 = vld [vmem:[#allocation7 + $0x50] sm:$0xff] }
  0x3c   :  { %336 = vmatprep.subr.bf16.mxu1 %v465_v0  ;;  %v343_v20 = vpack.c.bf16 %v153_v19, %v152_v18  ;;  %v346_v23 = vpack.c.bf16 %v155_v22, %v154_v21  ;;  %v157_v25 = vld [vmem:[#allocation7 + $0x58] sm:$0xff]  ;;  %v158_v27 = vld [vmem:[#allocation7 + $0x60] sm:$0xff]  ;;  %v159_v28 = vld [vmem:[#allocation7 + $0x68] sm:$0xff]  ;;  %p439_p13 = por %p438_p12, %p437_p11 }
  0x3d   :  { %v349_v26 = vpack.c.bf16 %v157_v25, %v156_v24  ;;  %v352_v29 = vpack.c.bf16 %v159_v28, %v158_v27  ;;  %v160_v30 = vld [vmem:[#allocation7 + $0x70] sm:$0xff]  ;;  %v161_v31 = vld [vmem:[#allocation7 + $0x78] sm:$0xff] }
  0x3e   :  { %332 = vmatpush3.bf16.msra.mxu0 %v331_v11  ;;  %v355_v32 = vpack.c.bf16 %v161_v31, %v160_v30  ;;  %v256_v33 = vld [vmem:[%s561_s2] ss:$0 sm:$0xff]  ;;  %p440_p0 = pnand %p439_p13, %p433_p10 }
  0x3f   :  { %338 = vmatpush3.bf16.msra.mxu1 %v337_v13  ;;  %v258_v37 = vld [vmem:[%s563_s4] ss:$0 sm:$0xff] }
  0x40   :  { %339 = vmatprep.subr.bf16.mxu1 %v465_v0 }
  0x41   :  { %290 = vmatmul.mubr.msk.f32.vlgmr.msra.gmra.mrb[0].mxu0 %vm72_vm1, %v60_v16 }
  0x43   :  { %341 = vmatpush3.bf16.msra.mxu1 %v340_v17 }
  0x44   :  { %342 = vmatprep.subr.bf16.mxu1 %v465_v0 }
  0x47   :  { %344 = vmatpush3.bf16.msra.mxu1 %v343_v20 }
  0x48   :  { %345 = vmatprep.subr.bf16.mxu1 %v465_v0 }
  0x4b   :  { %347 = vmatpush3.bf16.msra.mxu1 %v346_v23 }
  0x4c   :  { %348 = vmatprep.subr.bf16.mxu1 %v465_v0 }
  0x4f   :  { %350 = vmatpush3.bf16.msra.mxu1 %v349_v26 }
  0x50   :  { %351 = vmatprep.subr.bf16.mxu1 %v465_v0 }
  0x53   :  { %353 = vmatpush3.bf16.msra.mxu1 %v352_v29 }
  0x54   :  { %354 = vmatprep.subr.bf16.mxu1 %v465_v0 }
  0x57   :  { %356 = vmatpush3.bf16.msra.mxu1 %v355_v32 }
 0x114   :  { %v142_v34 = vpop.f32.mrb[0].mxu0 }
 0x115   :  { %v143_v35 = vadd.f32 %v256_v33, %v142_v34  ;;  %v291_v36 = vpop.f32.mrb[1].mxu0 }
 0x117   :  { %325 = vmatmul.mubr.f32.vlgmr.msra.gmra.mrb[0].mxu1 %v143_v35 }
 0x1ea   :  { %v235_v38 = vpop.f32.mrb[0].mxu1 }
 0x1eb   :  { %v236_v39 = vadd.f32 %v258_v37, %v235_v38  ;;  %v326_v40 = vpop.f32.mrb[1].mxu1 }
 0x1ed   :  { %239 = vst [vmem:[#allocation8] sm:$0xff] %v236_v39 }
 0x1ee   :  { %443 = shalt.err (!%p440_p0)
}
 0x1ef   :  { %s444_s11 = scalar_lea.hbm %s564_s5, 128 }
 0x1f0   :  { %p445_p1 = scmp.ne.s32.totalorder %s564_s5, %s444_s11  ;;  %p448_p2 = scmp.lt.u32.totalorder %s444_s11, %s564_s5 }
 0x1f2   :  { %p450_p3 = pnand %p448_p2, %p445_p1 }
 0x1f4   :  { %453 = shalt.err (!%p450_p3)
}
 0x1f5   :  { %249 = dma.vmem_to_hbm [thread:$0]  %s247_s8, 128, %s564_s5, [#allocation4]  }
 0x1f6   :  { %458 = dma.done.wait [#allocation4], 128  }
 0x1f7   :  { %459 = vsyncadd [#allocation4], 4294967168 }
 0x1f8   :  { %253 = vsyncpa [#allocation3], 1 }
 0x1f9   :  { %254 = vsyncpa [#allocation6], 1 }
 0x1fa   :  { %255 = vsyncpa [#allocation4], 1 }

// kernel: tpu_custom_call.1
= control target key start
LH: loop header
LB: loop body
LE: loop exit
PB: predicated region body
PF: predicated region fallthrough
CT: control target
= control target key end

     0   :  { %10 = vsyncpa [#allocation3], 0  ;;  %s559_s0 = inlined_call_operand.hbm [shape: f32[8,32], index: 0, kind: input, shape index: {}]   ;;  %s560_s1 = inlined_call_operand.hbm [shape: f32[32,128], index: 1, kind: input, shape index: {}]   ;;  %s561_s2 = inlined_call_operand.vmem [shape: f32[1,128], index: 2, kind: input, shape index: {}]   ;;  %s562_s3 = inlined_call_operand.hbm [shape: f32[128,128], index: 3, kind: input, shape index: {}]   ;;  %s563_s4 = inlined_call_operand.vmem [shape: f32[1,128], index: 4, kind: input, shape index: {}]   ;;  %s564_s5 = inlined_call_operand.hbm [shape: f32[8,128], index: 5, kind: output, shape index: {}]  }
   0x1   :  { %11 = vsyncpa [#allocation6], 0 }
   0x2   :  { %12 = vsyncpa [#allocation4], 0  ;;  %s460_s18 = smov [#allocation5]   ;;  %s366_s22 = scalar_lea.hbm %s560_s1, 512 }
   0x3   :  { %s28_s19 = sshll.u32 %s460_s18, 4  ;;  %p367_p0 = scmp.ne.s32.totalorder %s560_s1, %s366_s22  ;;  %s29_s19 = int_to_ptr.vmem [resolvable:$true] %s28_s19 }
   0x4   :  { %p370_p1 = scmp.lt.u32.totalorder %s366_s22, %s560_s1 }
   0x6   :  { %p372_p2 = pnand %p370_p1, %p367_p0 }
   0x8   :  { %375 = shalt.err (!%p372_p2)
}
   0x9   :  { %s376_s27 = scalar_lea.vmem %s29_s19, 512  ;;  %p381_p4 = scmp.lt.s32.totalorder %s29_s19, %s29_s19 }
   0xa   :  { %p377_p3 = scmp.ne.s32.totalorder %s29_s19, %s376_s27  ;;  %p382_p5 = scmp.lt.s32.totalorder %s376_s27, %s376_s27 }
   0xc   :  { %p383_p6 = por %p382_p5, %p381_p4 }
   0xe   :  { %p384_p7 = pnand %p383_p6, %p377_p3 }
  0x10   :  { %387 = shalt.err (!%p384_p7)
}
  0x11   :  { %s461_s28 = smov 128   ;;  %s462_s29 = smov 8  }
  0x12   :  { %34 = dma.hbm_to_vmem [thread:$0]  %s560_s1, 512, %s29_s19, [#allocation6], %s461_s28, %s461_s28, %s462_s29  }
  0x13   :  { %s463_s7 = smov [#allocation2]   ;;  %s464_s9 = smov [#allocation7]  }
  0x14   :  { %s19_s8 = sshll.u32 %s463_s7, 4  ;;  %s42_s10 = sshll.u32 %s464_s9, 4  ;;  %s20_s8 = int_to_ptr.vmem [resolvable:$true] %s19_s8  ;;  %s43_s10 = int_to_ptr.vmem [resolvable:$true] %s42_s10 }
  0x15   :  { %s388_s13 = scalar_lea.hbm %s559_s0, 128 }
  0x16   :  { %p389_p8 = scmp.ne.s32.totalorder %s559_s0, %s388_s13  ;;  %p392_p9 = scmp.lt.u32.totalorder %s388_s13, %s559_s0 }
  0x18   :  { %p394_p10 = pnand %p392_p9, %p389_p8 }
  0x1a   :  { %397 = shalt.err (!%p394_p10)
}
  0x1b   :  { %s398_s1 = scalar_lea.vmem %s20_s8, 128  ;;  %p403_p12 = scmp.lt.s32.totalorder %s20_s8, %s20_s8 }
  0x1c   :  { %p399_p11 = scmp.ne.s32.totalorder %s20_s8, %s398_s1  ;;  %p404_p13 = scmp.lt.s32.totalorder %s398_s1, %s398_s1 }
  0x1e   :  { %p405_p0 = por %p404_p13, %p403_p12 }
  0x20   :  { %p406_p1 = pnand %p405_p0, %p399_p11 }
  0x22   :  { %409 = shalt.err (!%p406_p1)
}
  0x23   :  { %22 = dma.hbm_to_vmem [thread:$0]  %s559_s0, 128, %s20_s8, [#allocation3]  }
  0x24   :  { %s410_s22 = scalar_lea.hbm %s562_s3, 2048 }
  0x25   :  { %p411_p2 = scmp.ne.s32.totalorder %s562_s3, %s410_s22  ;;  %p414_p3 = scmp.lt.u32.totalorder %s410_s22, %s562_s3 }
  0x27   :  { %p416_p4 = pnand %p414_p3, %p411_p2 }
  0x29   :  { %419 = shalt.err (!%p416_p4)
}
  0x2a   :  { %s420_s27 = scalar_lea.vmem %s43_s10, 2048  ;;  %p425_p6 = scmp.lt.s32.totalorder %s43_s10, %s43_s10 }
  0x2b   :  { %p421_p5 = scmp.ne.s32.totalorder %s43_s10, %s420_s27  ;;  %p426_p7 = scmp.lt.s32.totalorder %s420_s27, %s420_s27 }
  0x2d   :  { %p427_p8 = por %p426_p7, %p425_p6 }
  0x2f   :  { %p428_p9 = pnand %p427_p8, %p421_p5 }
  0x31   :  { %431 = shalt.err (!%p428_p9)
}
  0x32   :  { %48 = dma.hbm_to_vmem [thread:$0]  %s562_s3, 2048, %s43_s10, [#allocation6], %s461_s28, %s461_s28, %s462_s29  }
  0x33   :  { %454 = dma.done.wait [#allocation3], 128  }
  0x34   :  { %455 = vsyncadd [#allocation3], 4294967168 }
  0x35   :  { %456 = dma.done.wait [#allocation6], 2560  }
  0x36   :  { %457 = vsyncadd [#allocation6], 4294964736  ;;  %v465_v0 = vmov 0.0|0.0   ;;  %vm466_vm0 = vmmov 0   ;;  %v467_v1 = vmov 0.0   ;;  %v61_v2 = vld [vmem:[#allocation5] sm:$0xff] }
  0x37   :  { %327 = vmatprep.subr.bf16.mxu0 %v465_v0  ;;  %289 = vmatprep.mubr.msk.f32.mxu0 %vm466_vm0, %v467_v1  ;;  %v62_v3 = vld [vmem:[#allocation5 + $0x8] sm:$0xff]  ;;  %v63_v4 = vld [vmem:[#allocation5 + $0x10] sm:$0xff]  ;;  %v64_v6 = vld [vmem:[#allocation5 + $0x18] sm:$0xff]  ;;  %vm72_vm1 = vcmask 261120   ;;  %s468_s7 = smov [#allocation8]  }
  0x38   :  { %333 = vmatprep.subr.bf16.mxu1 %v465_v0  ;;  %324 = vmatprep.mubr.msk.f32.mxu1 %vm466_vm0, %v467_v1  ;;  %v328_v5 = vpack.c.bf16 %v62_v3, %v61_v2  ;;  %v146_v7 = vld [vmem:[#allocation7] sm:$0xff]  ;;  %v147_v8 = vld [vmem:[#allocation7 + $0x8] sm:$0xff]  ;;  %v148_v9 = vld [vmem:[#allocation7 + $0x10] sm:$0xff]  ;;  %v331_v11 = vpack.c.bf16 %v64_v6, %v63_v4  ;;  %s246_s8 = sshll.u32 %s468_s7, 4  ;;  %s247_s8 = int_to_ptr.vmem [resolvable:$true] %s246_s8 }
  0x39   :  { %v149_v10 = vld [vmem:[#allocation7 + $0x18] sm:$0xff]  ;;  %v334_v12 = vpack.c.bf16 %v147_v8, %v146_v7  ;;  %v150_v14 = vld [vmem:[#allocation7 + $0x20] sm:$0xff]  ;;  %v151_v15 = vld [vmem:[#allocation7 + $0x28] sm:$0xff]  ;;  %s432_s9 = scalar_lea.vmem %s247_s8, 128  ;;  %p437_p11 = scmp.lt.s32.totalorder %s247_s8, %s247_s8 }
  0x3a   :  { %329 = vmatpush3.bf16.msra.mxu0 %v328_v5  ;;  %v337_v13 = vpack.c.bf16 %v149_v10, %v148_v9  ;;  %v60_v16 = vld [vmem:[#allocation2] sm:$0xff]  ;;  %v340_v17 = vpack.c.bf16 %v151_v15, %v150_v14  ;;  %v152_v18 = vld [vmem:[#allocation7 + $0x30] sm:$0xff]  ;;  %v154_v21 = vld [vmem:[#allocation7 + $0x40] sm:$0xff]  ;;  %p433_p10 = scmp.ne.s32.totalorder %s247_s8, %s432_s9  ;;  %p438_p12 = scmp.lt.s32.totalorder %s432_s9, %s432_s9 }
  0x3b   :  { %330 = vmatprep.subr.bf16.mxu0 %v465_v0  ;;  %335 = vmatpush3.bf16.msra.mxu1 %v334_v12  ;;  %v153_v19 = vld [vmem:[#allocation7 + $0x38] sm:$0xff]  ;;  %v155_v22 = vld [vmem:[#allocation7 + $0x48] sm:$0xff]  ;;  %v156_v24 = vld [vmem:[#allocation7 + $0x50] sm:$0xff] }
  0x3c   :  { %336 = vmatprep.subr.bf16.mxu1 %v465_v0  ;;  %v343_v20 = vpack.c.bf16 %v153_v19, %v152_v18  ;;  %v346_v23 = vpack.c.bf16 %v155_v22, %v154_v21  ;;  %v157_v25 = vld [vmem:[#allocation7 + $0x58] sm:$0xff]  ;;  %v158_v27 = vld [vmem:[#allocation7 + $0x60] sm:$0xff]  ;;  %v159_v28 = vld [vmem:[#allocation7 + $0x68] sm:$0xff]  ;;  %p439_p13 = por %p438_p12, %p437_p11 }
  0x3d   :  { %v349_v26 = vpack.c.bf16 %v157_v25, %v156_v24  ;;  %v352_v29 = vpack.c.bf16 %v159_v28, %v158_v27  ;;  %v160_v30 = vld [vmem:[#allocation7 + $0x70] sm:$0xff]  ;;  %v161_v31 = vld [vmem:[#allocation7 + $0x78] sm:$0xff] }
  0x3e   :  { %332 = vmatpush3.bf16.msra.mxu0 %v331_v11  ;;  %v355_v32 = vpack.c.bf16 %v161_v31, %v160_v30  ;;  %v256_v33 = vld [vmem:[%s561_s2] ss:$0 sm:$0xff]  ;;  %p440_p0 = pnand %p439_p13, %p433_p10 }
  0x3f   :  { %338 = vmatpush3.bf16.msra.mxu1 %v337_v13  ;;  %v258_v37 = vld [vmem:[%s563_s4] ss:$0 sm:$0xff] }
  0x40   :  { %339 = vmatprep.subr.bf16.mxu1 %v465_v0 }
  0x41   :  { %290 = vmatmul.mubr.msk.f32.vlgmr.msra.gmra.mrb[0].mxu0 %vm72_vm1, %v60_v16 }
  0x43   :  { %341 = vmatpush3.bf16.msra.mxu1 %v340_v17 }
  0x44   :  { %342 = vmatprep.subr.bf16.mxu1 %v465_v0 }
  0x47   :  { %344 = vmatpush3.bf16.msra.mxu1 %v343_v20 }
  0x48   :  { %345 = vmatprep.subr.bf16.mxu1 %v465_v0 }
  0x4b   :  { %347 = vmatpush3.bf16.msra.mxu1 %v346_v23 }
  0x4c   :  { %348 = vmatprep.subr.bf16.mxu1 %v465_v0 }
  0x4f   :  { %350 = vmatpush3.bf16.msra.mxu1 %v349_v26 }
  0x50   :  { %351 = vmatprep.subr.bf16.mxu1 %v465_v0 }
  0x53   :  { %353 = vmatpush3.bf16.msra.mxu1 %v352_v29 }
  0x54   :  { %354 = vmatprep.subr.bf16.mxu1 %v465_v0 }
  0x57   :  { %356 = vmatpush3.bf16.msra.mxu1 %v355_v32 }
 0x114   :  { %v142_v34 = vpop.f32.mrb[0].mxu0 }
 0x115   :  { %v143_v35 = vadd.f32 %v256_v33, %v142_v34  ;;  %v291_v36 = vpop.f32.mrb[1].mxu0 }
 0x117   :  { %325 = vmatmul.mubr.f32.vlgmr.msra.gmra.mrb[0].mxu1 %v143_v35 }
 0x1ea   :  { %v235_v38 = vpop.f32.mrb[0].mxu1 }
 0x1eb   :  { %v236_v39 = vadd.f32 %v258_v37, %v235_v38  ;;  %v326_v40 = vpop.f32.mrb[1].mxu1 }
 0x1ed   :  { %239 = vst [vmem:[#allocation8] sm:$0xff] %v236_v39 }
 0x1ee   :  { %443 = shalt.err (!%p440_p0)
}
 0x1ef   :  { %s444_s11 = scalar_lea.hbm %s564_s5, 128 }
 0x1f0   :  { %p445_p1 = scmp.ne.s32.totalorder %s564_s5, %s444_s11  ;;  %p448_p2 = scmp.lt.u32.totalorder %s444_s11, %s564_s5 }
 0x1f2   :  { %p450_p3 = pnand %p448_p2, %p445_p1 }
 0x1f4   :  { %453 = shalt.err (!%p450_p3)
}
 0x1f5   :  { %249 = dma.vmem_to_hbm [thread:$0]  %s247_s8, 128, %s564_s5, [#allocation4]  }
 0x1f6   :  { %458 = dma.done.wait [#allocation4], 128  }
 0x1f7   :  { %459 = vsyncadd [#allocation4], 4294967168 }
 0x1f8   :  { %253 = vsyncpa [#allocation3], 1 }
 0x1f9   :  { %254 = vsyncpa [#allocation6], 1 }
 0x1fa   :  { %255 = vsyncpa [#allocation4], 1 }

</bundles_post_ra>
